<compile_context>
chip_gen: v5e
topology: v5e:2x2
jax: 0.10.0
libtpu: 0.0.40
codegen_flags: <defaults>
</compile_context>

<pallas_src>
import math
from functools import partial

import jax
import jax.numpy as jnp
import numpy as np
from jax.experimental import pallas as pl
from jax.experimental.pallas import tpu as pltpu


# ----------------------------------------------------------------------------
# pltpu.roll sign probe (run once): +1 if pltpu.roll matches np.roll semantics
# (result[i] = x[i - shift]), -1 otherwise.  Makes the tap shifts convention-
# proof at negligible cost.
# ----------------------------------------------------------------------------
_ROLL_SIGN = None


def _roll_sign():
    global _ROLL_SIGN
    if _ROLL_SIGN is None:
        def k(x_ref, o_ref):
            o_ref[...] = pltpu.roll(x_ref[...], shift=1, axis=1)

        x = jnp.broadcast_to(jnp.arange(128, dtype=jnp.float32), (8, 128))
        y = pl.pallas_call(
            k, out_shape=jax.ShapeDtypeStruct((8, 128), jnp.float32))(x)
        y = np.asarray(jax.block_until_ready(y))
        _ROLL_SIGN = 1 if np.array_equal(
            y, np.roll(np.asarray(x), 1, axis=1)) else -1
    return _ROLL_SIGN


# ----------------------------------------------------------------------------
# Fused Pallas kernel
# ----------------------------------------------------------------------------
def _ufa_kernel(x_ref, wm_ref, bm_ref, wffb_ref, bffb_ref, wl_ref, bl_ref,
                tsp_ref, mask_ref, out_ref, ori_ref, att_ref,
                *, H, W, roll_sign):
    HW = H * W
    eps = 1e-10
    f32 = jnp.float32
    offs = [dy * W + dx for dy in (-1, 0, 1) for dx in (-1, 0, 1)]

    def leaky(v):
        return jnp.where(v >= 0, v, 0.01 * v)

    masks2 = mask_ref[...]                 # (9, 2*HW), both streams tiled
    masks1 = masks2[:, :HW]                # (9, HW), single stream

    def conv3x3(x, w9, bias, masks, act):
        # x: (cin, L) lane-dense; w9: (9, cout, cin); bias: (cout, 1).
        # SAME 3x3 conv = 9 accumulated MXU matmuls over lane-rolled, border-
        # masked copies of x (rolls go to the XLU slot, no concats).
        L = x.shape[1]
        y = None
        for k in range(9):
            off = offs[k]
            if off == 0:
                xk = x
            else:
                sh = (-roll_sign * off) % L
                xk = pltpu.roll(x, shift=sh, axis=1) * masks[k][None, :]
            t = jnp.dot(w9[k], xk, preferred_element_type=f32)
            y = t if y is None else y + t
        y = y + bias
        return leaky(y) if act else y

    x = x_ref[0]                           # (C, 2*HW): [x1 | x2], chan-padded

    # FEB_1 (slot 0)
    F = conv3x3(x, wm_ref[0], bm_ref[0], masks2, True)

    # FEB_23 / FEB_45 / FEB_67 (slots 1..6): conv -> conv -> LeakyReLU
    for i in range(3):
        F = conv3x3(F, wm_ref[1 + 2 * i], bm_ref[1 + 2 * i], masks2, False)
        F = conv3x3(F, wm_ref[2 + 2 * i], bm_ref[2 + 2 * i], masks2, True)

    # UFA.conv1 (slot 7)
    xa = conv3x3(F, wm_ref[7], bm_ref[7], masks2, True)
    ori_ref[0] = xa                        # [F1_ori | F2_ori]

    # ChannelAttentionBlock (numerically-stable 2-way softmax per channel)
    ca1 = jnp.mean(xa[:, :HW], axis=1, keepdims=True)      # (C, 1)
    ca2 = jnp.mean(xa[:, HW:], axis=1, keepdims=True)
    cm = jnp.maximum(ca1, ca2)
    e1 = jnp.exp(ca1 - cm)
    e2 = jnp.exp(ca2 - cm)
    den = e1 + e2 + eps
    xc = jnp.concatenate([(e1 / den) * xa[:, :HW],
                          (e2 / den) * xa[:, HW:]], axis=1)  # (C, 2*HW)

    # SpatialAttentionBlock: the 7x7 conv over the (avg, max) maps is one
    # lane-dense precomputed-Toeplitz matmul per stream: (1, 2HW) @ (2HW, HW).
    avg = jnp.mean(xc, axis=0, keepdims=True)               # (1, 2*HW)
    mx = jnp.max(xc, axis=0, keepdims=True)
    feats1 = jnp.concatenate([avg[:, :HW], mx[:, :HW]], axis=1)   # (1, 2*HW)
    feats2 = jnp.concatenate([avg[:, HW:], mx[:, HW:]], axis=1)
    a1 = jnp.dot(feats1, tsp_ref[0], preferred_element_type=f32)  # (1, HW)
    a2 = jnp.dot(feats2, tsp_ref[1], preferred_element_type=f32)
    am = jnp.maximum(a1, a2)
    s1 = jnp.exp(a1 - am)
    s2 = jnp.exp(a2 - am)
    xs = jnp.concatenate([(s1 / (s1 + s2 + eps)) * xc[:, :HW],
                          (s2 / (s2 + s1 + eps)) * xc[:, HW:]], axis=1)
    att_ref[0] = xs                        # [F1_att | F2_att]

    # UFA.conv2 (slot 8)
    Fo = conv3x3(xs, wm_ref[8], bm_ref[8], masks2, True)

    # FFB: 1x1 conv on the channel concat -> one (C, 2C) @ (2C, HW) matmul
    cat = jnp.concatenate([Fo[:, :HW], Fo[:, HW:]], axis=0)       # (2C, HW)
    fusion = jnp.dot(wffb_ref[...], cat, preferred_element_type=f32) \
        + bffb_ref[...]

    # ICB1-3 (slots 9..11), ICB4 + model-level extra sigmoid
    fusion = conv3x3(fusion, wm_ref[9], bm_ref[9], masks1, True)
    fusion = conv3x3(fusion, wm_ref[10], bm_ref[10], masks1, True)
    fusion = conv3x3(fusion, wm_ref[11], bm_ref[11], masks1, True)
    out = conv3x3(fusion, wl_ref[...], bl_ref[...], masks1, False)
    out_ref[0] = jax.nn.sigmoid(jax.nn.sigmoid(out))


# ----------------------------------------------------------------------------
# Host-side packing helpers
# ----------------------------------------------------------------------------
def _pack_taps(w_hwio, cin_pad=None):
    # HWIO (3,3,Cin,Cout) -> (9, Cout, Cin'), optionally zero-padding Cin.
    kh, kw, ci, co = w_hwio.shape
    w = w_hwio
    if cin_pad is not None and cin_pad > ci:
        w = jnp.concatenate(
            [w, jnp.zeros((kh, kw, cin_pad - ci, co), w.dtype)], axis=2)
    return jnp.transpose(w, (0, 1, 3, 2)).reshape(kh * kw, co, w.shape[2])


def _tap_masks(H, W):
    # mask[k, y*W+x] = 1 iff pixel (y+dy, x+dx) is inside the image for tap k.
    m = np.zeros((9, H, W), np.float32)
    k = 0
    for dy in (-1, 0, 1):
        for dx in (-1, 0, 1):
            m[k, max(0, -dy):H - max(0, dy), max(0, -dx):W - max(0, dx)] = 1.0
            k += 1
    m = m.reshape(9, H * W)
    return np.concatenate([m, m], axis=1)          # tiled for both streams


def _sp_toeplitz(w_flat, H, W):
    # Full Toeplitz matrix of the 7x7 SpatialAttention conv:
    #   logits_flat = [avg_flat | max_flat] (1, 2HW) @ T (2HW, HW)
    # w_flat layout: index = (dy*7 + dx)*2 + c   (c: 0=avg, 1=max)
    w = np.asarray(w_flat).reshape(7, 7, 2)
    HW = H * W
    T = np.zeros((2 * HW, HW), np.float32)
    for y in range(H):
        for x in range(W):
            i = y * W + x
            for dy in range(7):
                yy = y + dy - 3
                if yy < 0 or yy >= H:
                    continue
                for dx in range(7):
                    xx = x + dx - 3
                    if xx < 0 or xx >= W:
                        continue
                    j = yy * W + xx
                    T[j, i] += w[dy, dx, 0]
                    T[HW + j, i] += w[dy, dx, 1]
    return T


# ----------------------------------------------------------------------------
# pallas_call wrapper
# ----------------------------------------------------------------------------
def ufa_forward(params, x1, x2):
    N, H, W, cin = x1.shape
    C = params["feb1_w"].shape[-1]
    HW = H * W
    f32 = jnp.float32
    sign = _roll_sign()

    # ---- pack operands (tiny host-side work) -------------------------------
    w_main = jnp.stack([
        _pack_taps(params["feb1_w"], cin_pad=C),
        _pack_taps(params["feb23_wa"]), _pack_taps(params["feb23_wb"]),
        _pack_taps(params["feb45_wa"]), _pack_taps(params["feb45_wb"]),
        _pack_taps(params["feb67_wa"]), _pack_taps(params["feb67_wb"]),
        _pack_taps(params["ufa_c1_w"]), _pack_taps(params["ufa_c2_w"]),
        _pack_taps(params["icb1_w"]), _pack_taps(params["icb2_w"]),
        _pack_taps(params["icb3_w"]),
    ], axis=0)                                        # (12, 9, C, C)
    b_main = jnp.stack([
        params["feb1_b"],
        params["feb23_ba"], params["feb23_bb"],
        params["feb45_ba"], params["feb45_bb"],
        params["feb67_ba"], params["feb67_bb"],
        params["ufa_c1_b"], params["ufa_c2_b"],
        params["icb1_b"], params["icb2_b"], params["icb3_b"],
    ], axis=0)[:, :, None]                            # (12, C, 1)
    w_ffb = jnp.transpose(params["ffb_w"])            # (C, 2C)
    b_ffb = params["ffb_b"][:, None]                  # (C, 1)
    w_last = _pack_taps(params["icb4_w"])             # (9, cin, C)
    b_last = params["icb4_b"][:, None]                # (cin, 1)
    t_sp = jnp.asarray(np.stack([_sp_toeplitz(params["sp_w1"], H, W),
                                 _sp_toeplitz(params["sp_w2"], H, W)]))
    masks = jnp.asarray(_tap_masks(H, W))             # (9, 2*HW)

    def to_cl(x):   # NHWC -> channel-major lane-dense (N, C, H*W)
        x = jnp.transpose(x, (0, 3, 1, 2)).reshape(N, cin, HW)
        return jnp.pad(x, ((0, 0), (0, C - cin), (0, 0)))

    x = jnp.concatenate([to_cl(x1), to_cl(x2)], axis=2)   # (N, C, 2*HW)

    def rep(shape):
        return pl.BlockSpec(shape, lambda n: (0,) * len(shape))

    out_shape = (
        jax.ShapeDtypeStruct((N, cin, HW), f32),          # output (lane-dense)
        jax.ShapeDtypeStruct((N, C, 2 * HW), f32),        # [F1_ori | F2_ori]
        jax.ShapeDtypeStruct((N, C, 2 * HW), f32),        # [F1_att | F2_att]
    )
    out_specs = (
        pl.BlockSpec((1, cin, HW), lambda n: (n, 0, 0)),
        pl.BlockSpec((1, C, 2 * HW), lambda n: (n, 0, 0)),
        pl.BlockSpec((1, C, 2 * HW), lambda n: (n, 0, 0)),
    )

    out_cl, ori, att = pl.pallas_call(
        partial(_ufa_kernel, H=H, W=W, roll_sign=sign),
        out_shape=out_shape,
        grid=(N,),
        in_specs=[
            pl.BlockSpec((1, C, 2 * HW), lambda n: (n, 0, 0)),
            rep((12, 9, C, C)), rep((12, C, 1)),
            rep((C, 2 * C)), rep((C, 1)),
            rep((9, cin, C)), rep((cin, 1)),
            rep((2, 2 * HW, HW)), rep((9, 2 * HW)),
        ],
        out_specs=out_specs,
        compiler_params=pltpu.CompilerParams(
            dimension_semantics=("parallel",),
            vmem_limit_bytes=32 * 1024 * 1024),
    )(x, w_main, b_main, w_ffb, b_ffb, w_last, b_last, t_sp, masks)

    def to_nhwc(y):   # (N, c, H*W) -> (N, H, W, c)
        c = y.shape[1]
        return jnp.transpose(y.reshape(N, c, H, W), (0, 2, 3, 1))

    return (to_nhwc(out_cl),
            to_nhwc(ori[:, :, :HW]), to_nhwc(ori[:, :, HW:]),
            to_nhwc(att[:, :, :HW]), to_nhwc(att[:, :, HW:]))


# ----------------------------------------------------------------------------
# Parameters (deterministic synthetic init)
# ----------------------------------------------------------------------------
def make_params(in_ch=3, C=32):
    key = jax.random.PRNGKey(42)
    keys = iter(jax.random.split(key, 64))

    def w3(cin, cout):
        return jax.random.normal(next(keys), (3, 3, cin, cout), jnp.float32) \
            * (1.0 / math.sqrt(9 * cin))

    def bias(cout):
        return jax.random.normal(next(keys), (cout,), jnp.float32) * 0.01

    p = {}
    p["feb1_w"], p["feb1_b"] = w3(in_ch, C), bias(C)
    for blk in ("feb23", "feb45", "feb67"):
        p[blk + "_wa"], p[blk + "_ba"] = w3(C, C), bias(C)
        p[blk + "_wb"], p[blk + "_bb"] = w3(C, C), bias(C)
    p["ufa_c1_w"], p["ufa_c1_b"] = w3(C, C), bias(C)
    p["ufa_c2_w"], p["ufa_c2_b"] = w3(C, C), bias(C)
    # SpatialAttention 7x7 convs (2 -> 1, no bias), flat layout (dy, dx, in_ch)
    p["sp_w1"] = jax.random.normal(next(keys), (98,), jnp.float32) / math.sqrt(98.0)
    p["sp_w2"] = jax.random.normal(next(keys), (98,), jnp.float32) / math.sqrt(98.0)
    p["ffb_w"] = jax.random.normal(next(keys), (2 * C, C), jnp.float32) \
        / math.sqrt(2 * C)
    p["ffb_b"] = bias(C)
    for i in (1, 2, 3):
        p[f"icb{i}_w"], p[f"icb{i}_b"] = w3(C, C), bias(C)
    p["icb4_w"], p["icb4_b"] = w3(C, in_ch), bias(in_ch)
    return p


# ----------------------------------------------------------------------------
# Pure-JAX reference (for validation)
# ----------------------------------------------------------------------------
def _apply_act(x, act):
    if act == "none":
        return x
    if act == "leaky":
        return jnp.where(x >= 0, x, 0.01 * x)
    if act == "sigmoid2":
        return jax.nn.sigmoid(jax.nn.sigmoid(x))
    raise ValueError(act)


def _ref_conv(x, w, b=None, act="none"):
    out = jax.lax.conv_general_dilated(
        x, w, (1, 1), "SAME", dimension_numbers=("NHWC", "HWIO", "NHWC"))
    if b is not None:
        out = out + b
    return _apply_act(out, act)


def ref_forward(params, x1, x2):
    eps = 1e-10
    F1 = _ref_conv(x1, params["feb1_w"], params["feb1_b"], "leaky")
    F2 = _ref_conv(x2, params["feb1_w"], params["feb1_b"], "leaky")
    for blk in ("feb23", "feb45", "feb67"):
        wa, ba = params[blk + "_wa"], params[blk + "_ba"]
        wb, bb = params[blk + "_wb"], params[blk + "_bb"]
        F1 = _ref_conv(_ref_conv(F1, wa, ba, "none"), wb, bb, "leaky")
        F2 = _ref_conv(_ref_conv(F2, wa, ba, "none"), wb, bb, "leaky")
    x1a = _ref_conv(F1, params["ufa_c1_w"], params["ufa_c1_b"], "leaky")
    x2a = _ref_conv(F2, params["ufa_c1_w"], params["ufa_c1_b"], "leaky")
    ca1 = jnp.mean(x1a, axis=(1, 2), keepdims=True)
    ca2 = jnp.mean(x2a, axis=(1, 2), keepdims=True)
    x1c = jnp.exp(ca1) / (jnp.exp(ca2) + jnp.exp(ca1) + eps) * x1a
    x2c = jnp.exp(ca2) / (jnp.exp(ca1) + jnp.exp(ca2) + eps) * x2a

    def sp_att(x, w_flat):
        feat = jnp.concatenate([jnp.mean(x, axis=-1, keepdims=True),
                                jnp.max(x, axis=-1, keepdims=True)], axis=-1)
        w = w_flat.reshape(7, 7, 2, 1)
        return jax.lax.conv_general_dilated(
            feat, w, (1, 1), "SAME", dimension_numbers=("NHWC", "HWIO", "NHWC"))

    a1 = sp_att(x1c, params["sp_w1"])
    a2 = sp_att(x2c, params["sp_w2"])
    m1 = jnp.exp(a1) / (jnp.exp(a1) + jnp.exp(a2) + eps)
    m2 = jnp.exp(a2) / (jnp.exp(a2) + jnp.exp(a1) + eps)
    x1s, x2s = m1 * x1c, m2 * x2c
    F1o = _ref_conv(x1s, params["ufa_c2_w"], params["ufa_c2_b"], "leaky")
    F2o = _ref_conv(x2s, params["ufa_c2_w"], params["ufa_c2_b"], "leaky")
    C = params["ffb_w"].shape[-1]
    fusion = _ref_conv(jnp.concatenate([F1o, F2o], axis=-1),
                       params["ffb_w"].reshape(1, 1, 2 * C, C), params["ffb_b"])
    fusion = _ref_conv(fusion, params["icb1_w"], params["icb1_b"], "leaky")
    fusion = _ref_conv(fusion, params["icb2_w"], params["icb2_b"], "leaky")
    fusion = _ref_conv(fusion, params["icb3_w"], params["icb3_b"], "leaky")
    output = _ref_conv(fusion, params["icb4_w"], params["icb4_b"], "sigmoid2")
    return output, x1a, x2a, x1s, x2s


# ----------------------------------------------------------------------------
if __name__ == "__main__":
    N, IN_CH, C, H, W = 2, 3, 32, 16, 16
    key = jax.random.PRNGKey(0)
    k1, k2 = jax.random.split(key)
    x1 = jax.random.normal(k1, (N, H, W, IN_CH), jnp.float32)
    x2 = jax.random.normal(k2, (N, H, W, IN_CH), jnp.float32)

    params = make_params(IN_CH, C)

    outs = jax.block_until_ready(ufa_forward(params, x1, x2))
    refs = jax.block_until_ready(ref_forward(params, x1, x2))

    for o, r in zip(outs, refs):
        np.testing.assert_allclose(np.asarray(o), np.asarray(r),
                                   rtol=2e-3, atol=2e-3)

    print("KERNEL_OK")
</pallas_src>

<mosaic_0001>
module attributes {stable_mosaic.version = 11 : i64} {
  func.func @k(%arg0: memref<8x128xf32, #tpu.memory_space<vmem>>, %arg1: memref<8x128xf32, #tpu.memory_space<vmem>>) attributes {dimension_semantics = [], scalar_prefetch = 0 : i64, scratch_operands = 0 : i64, tpu.core_type = #tpu.core_type<tc>} {
    %c0 = arith.constant 0 : index
    %c0_0 = arith.constant 0 : index
    %0 = vector.load %arg0[%c0, %c0_0] : memref<8x128xf32, #tpu.memory_space<vmem>>, vector<8x128xf32>
    %c1_i32 = arith.constant 1 : i32
    %1 = tpu.dynamic_rotate %0 by %c1_i32 dim 1 : vector<8x128xf32>, i32 -> vector<8x128xf32>
    %c0_1 = arith.constant 0 : index
    %c0_2 = arith.constant 0 : index
    %2 = vector.load %arg1[%c0_1, %c0_2] : memref<8x128xf32, #tpu.memory_space<vmem>>, vector<8x128xf32>
    tpu.vector_store %arg1[%c0_1, %c0_2], %1 {strides = array<i32>} : memref<8x128xf32, #tpu.memory_space<vmem>>, vector<8x128xf32>,
    return
  }
}

</mosaic_0001>

<bundles_post_ra>
// kernel: tpu_custom_call.1
= control target key start
LH: loop header
LB: loop body
LE: loop exit
PB: predicated region body
PF: predicated region fallthrough
CT: control target
= control target key end

     0   :  { %6 = vsyncpa [#allocation3], 0  ;;  %s118_s0 = inlined_call_operand.hbm [shape: f32[8,128], index: 0, kind: input, shape index: {}]   ;;  %s119_s1 = inlined_call_operand.hbm [shape: f32[8,128], index: 1, kind: output, shape index: {}]  }
   0x1   :  { %7 = vsyncpa [#allocation4], 0  ;;  %s13_s8 = sshll.u32 %s118_s0, 4  ;;  %s99_s9 = smov [#allocation2]   ;;  %s14_s8 = int_to_ptr.hbm [resolvable:$true] %s13_s8 }
   0x2   :  { %s15_s10 = sshll.u32 %s99_s9, 4  ;;  %s16_s10 = int_to_ptr.vmem [resolvable:$true] %s15_s10 }
   0x3   :  { %18 = dma.hbm_to_vmem [thread:$0]  %s14_s8, 128, %s16_s10, [#allocation3]  }
   0x4   :  { %95 = dma.done.wait [#allocation3], 128  }
   0x5   :  { %96 = vsyncadd [#allocation3], 4294967168  ;;  %v23_v0 = vld [vmem:[#allocation2] sm:$0xff]  ;;  %s100_s11 = smov 1   ;;  %s101_s12 = smov [#allocation5]  }
   0x6   :  { %24 = vrot.lane.b32.xlu0 %v23_v0, %s100_s11  ;;  %s32_s13 = sshll.u32 %s101_s12, 4  ;;  %s34_s16 = sshll.u32 %s119_s1, 4  ;;  %s33_s13 = int_to_ptr.vmem [resolvable:$true] %s32_s13  ;;  %s35_s16 = int_to_ptr.hbm [resolvable:$true] %s34_s16 }
  0x78   :  { %v25_v1 = vpop.permute.xlu0 %24 }
  0x79   :  { %26 = vst [vmem:[#allocation5] sm:$0xff] %v25_v1 }
  0x7a   :  { %37 = dma.vmem_to_hbm [thread:$0]  %s33_s13, 128, %s35_s16, [#allocation4]  }
  0x7b   :  { %97 = dma.done.wait [#allocation4], 128  }
  0x7c   :  { %98 = vsyncadd [#allocation4], 4294967168 }
  0x7d   :  { %42 = vsyncpa [#allocation3], 1 }
  0x7e   :  { %43 = vsyncpa [#allocation4], 1 }

</bundles_post_ra>
